<compile_context>
chip_gen: v6e
topology: v6e:2x2x1
jax: 0.10.0
libtpu: 0.0.40
codegen_flags: <defaults>
</compile_context>

<pallas_src>
import functools

import jax
import jax.numpy as jnp
from jax.experimental import pallas as pl
from jax.experimental.pallas import tpu as pltpu

LANE = 128      # vreg lane width
SUBLANE = 8     # f32 sublane width


def _round_up(x, m):
    return ((x + m - 1) // m) * m


def _device_kind():
    try:
        return jax.devices()[0].device_kind.lower()
    except Exception:
        return ""


def _num_tensorcores():
    """Best-effort count of TensorCores behind one JAX device (megacore)."""
    kind = _device_kind()
    if "lite" in kind or "v5e" in kind or "v6e" in kind:
        return 1          # v5e / v6e: one TensorCore per chip
    if "v4" in kind or "v5" in kind or "7" in kind:
        return 2          # v4 / v5p / v7x: two TensorCores share one device
    return 1


def _vmem_cap_bytes():
    kind = _device_kind()
    if "7" in kind:
        return 48 << 20   # v7x: 64 MiB physical per TC -> keep headroom
    return 96 << 20       # v5e / v6e: 128 MiB physical VMEM


def _choose_batch_tiling(B, max_tile_rows, num_tc):
    """Pick (B_tile, grid_steps, B_pad) with B_pad ~= B and a balanced grid."""
    B8 = _round_up(B, SUBLANE)
    max_tile_rows = max(SUBLANE, _round_up(int(max_tile_rows), SUBLANE))
    n_tiles = pl.cdiv(B8, max_tile_rows)          # min #tiles respecting VMEM cap
    # Megacore: keep grid steps a multiple of the TC count so the "parallel"
    # split is balanced (grid=3 on 2 TCs would idle one TC for a third of it).
    if num_tc > 1 and B8 >= num_tc * SUBLANE:
        n_tiles = _round_up(n_tiles, num_tc)
    b_tile = _round_up(pl.cdiv(B8, n_tiles), SUBLANE)
    return b_tile, n_tiles, b_tile * n_tiles


def actor_kernel(x_ref, w1_ref, b1_ref, w2_ref, b2_ref, w3_ref, b3_ref,
                 o_ref, *, max_action):
    """Fused relu(x@W1+b1) -> relu(.@W2+b2) -> max_action*tanh(.@W3+b3)."""
    w_dtype = w1_ref.dtype
    x = x_ref[...].astype(w_dtype)

    # fc1 + relu   (MXU matmul, f32 accumulation; f32 epilogue keeps v5e's VPU happy)
    h1 = jnp.dot(x, w1_ref[...], preferred_element_type=jnp.float32)
    h1 = jnp.maximum(h1 + b1_ref[...].astype(jnp.float32), 0.0)

    # fc2 + relu
    h2 = jnp.dot(h1.astype(w_dtype), w2_ref[...], preferred_element_type=jnp.float32)
    h2 = jnp.maximum(h2 + b2_ref[...].astype(jnp.float32), 0.0)

    # output layer + tanh * max_action   (tanh goes to the EUP slot)
    o = jnp.dot(h2.astype(w_dtype), w3_ref[...], preferred_element_type=jnp.float32)
    o = max_action * jnp.tanh(o + b3_ref[...].astype(jnp.float32))
    o_ref[...] = o.astype(o_ref.dtype)


def actor_forward(x, params, max_action, *, max_tile_rows=2048,
                  single_buffer_weights=False):
    """x: (B, state_dim). params: (in,out) weights + (1,out) biases. Returns (B, action_dim)."""
    w1, b1 = params["w1"], params["b1"]
    w2, b2 = params["w2"], params["b2"]
    w3, b3 = params["w3"], params["b3"]

    B, S = x.shape
    H = w1.shape[1]
    A = w3.shape[1]

    # --- lane-dense output: pad action dim to a lane multiple so the output
    #     writeback uses full, unmasked vector stores (sliced off below).
    A_pad = _round_up(A, LANE)
    if A_pad != A:
        w3 = jnp.pad(w3, ((0, 0), (0, A_pad - A)))
        b3 = jnp.pad(b3, ((0, 0), (0, A_pad - A)))

    # --- adaptive batch tiling: B_pad ~= B; one big tile on single-TC chips,
    #     an even number of tiles on megacore chips.
    num_tc = _num_tensorcores()
    B_tile, grid_steps, B_pad = _choose_batch_tiling(B, max_tile_rows, num_tc)
    if B_pad != B:
        # Padded rows just compute relu(b1) -> tanh garbage; sliced off below.
        x = jnp.pad(x, ((0, B_pad - B), (0, 0)))
    grid = (grid_steps,)

    # --- VMEM budget: double-buffered x/out tiles + resident weights/biases
    #     + h1/h2 f32 activations.  Cap is per-chip (v7x has the smallest VMEM).
    x_isize = jnp.dtype(x.dtype).itemsize
    w_isize = jnp.dtype(w1.dtype).itemsize
    H_l = _round_up(H, LANE)
    wbuf = 1 if single_buffer_weights else 2
    vmem_est = (
        2 * B_tile * (_round_up(S, LANE) + A_pad) * x_isize
        + wbuf * (S * H_l + H_l * H_l + H_l * A_pad + 2 * H_l + A_pad) * w_isize
        + 2 * B_tile * H_l * 4
    )
    vmem_limit = int(min(max(2 * vmem_est + (4 << 20), 16 << 20), _vmem_cap_bytes()))

    cost = pl.CostEstimate(
        flops=2 * B_pad * (S * H + H * H + H * A_pad),
        transcendentals=B_pad * A_pad,
        bytes_accessed=x_isize * (B_pad * S + B_pad * A_pad)
        + w_isize * (S * H + H * H + H * A_pad + 2 * H + A_pad),
    )

    kernel = functools.partial(actor_kernel, max_action=float(max_action))

    def const(shape):
        # Constant block index -> the operand stays VMEM-resident across the
        # batch grid.  For large hidden dims on v7x, single-buffer it to halve
        # the resident weight footprint (it never changes block index anyway).
        if single_buffer_weights:
            return pl.BlockSpec(shape, lambda i: (0, 0), pipeline_mode=pl.Buffered(1))
        return pl.BlockSpec(shape, lambda i: (0, 0))

    out = pl.pallas_call(
        kernel,
        out_shape=jax.ShapeDtypeStruct((B_pad, A_pad), x.dtype),
        grid=grid,
        in_specs=[
            pl.BlockSpec((B_tile, S), lambda i: (i, 0)),   # x: streamed over batch tiles
            const((S, H)), const((1, H)),                  # fc1
            const((H, H)), const((1, H)),                  # fc2
            const((H, A_pad)), const((1, A_pad)),          # out layer (lane-padded)
        ],
        out_specs=pl.BlockSpec((B_tile, A_pad), lambda i: (i, 0)),
        compiler_params=pltpu.CompilerParams(
            dimension_semantics=("parallel",),   # megacore: batch tiles split across TCs
            vmem_limit_bytes=vmem_limit,
        ),
        cost_estimate=cost,
    )(x, w1, b1, w2, b2, w3, b3)

    return out[:B, :A]


def init_actor_params(key, state_dim, action_dim, hidden_dim, dtype=jnp.float32):
    """PyTorch nn.Linear-style init (uniform +/- 1/sqrt(fan_in)); weights are (in, out).

    Pass dtype=jnp.bfloat16 to store weights in the native MXU input format
    (cast once here, not per call).  Note bf16 weights also quantize the
    inter-layer activations inside the kernel (bf16-level drift vs f32 ref).
    """
    ks = jax.random.split(key, 6)

    def linear(kw, kb, fan_in, fan_out):
        bound = 1.0 / jnp.sqrt(fan_in)
        w = jax.random.uniform(kw, (fan_in, fan_out), jnp.float32, -bound, bound)
        b = jax.random.uniform(kb, (1, fan_out), jnp.float32, -bound, bound)
        return w.astype(dtype), b.astype(dtype)

    w1, b1 = linear(ks[0], ks[1], state_dim, hidden_dim)
    w2, b2 = linear(ks[2], ks[3], hidden_dim, hidden_dim)
    w3, b3 = linear(ks[4], ks[5], hidden_dim, action_dim)
    return {"w1": w1, "b1": b1, "w2": w2, "b2": b2, "w3": w3, "b3": b3}


def actor_reference(x, params, max_action):
    f32 = lambda a: a.astype(jnp.float32)
    h1 = jnp.maximum(x @ f32(params["w1"]) + f32(params["b1"]), 0.0)
    h2 = jnp.maximum(h1 @ f32(params["w2"]) + f32(params["b2"]), 0.0)
    return max_action * jnp.tanh(h2 @ f32(params["w3"]) + f32(params["b3"]))


if __name__ == "__main__":
    key = jax.random.PRNGKey(0)
    kx, kp, kx2, kp2 = jax.random.split(key, 4)
    max_action = 2.0

    # --- 1) small f32 check (shapes consistent with the module's forward) ------
    batch, state_dim, hidden_dim, action_dim = 8, 16, 32, 4
    x = jax.random.normal(kx, (batch, state_dim), dtype=jnp.float32)
    params = init_actor_params(kp, state_dim, action_dim, hidden_dim)

    out = jax.block_until_ready(actor_forward(x, params, max_action))
    ref = actor_reference(x, params, max_action)
    assert out.shape == (batch, action_dim)
    assert jnp.allclose(out, ref, atol=1e-4, rtol=1e-4), float(jnp.max(jnp.abs(out - ref)))

    # --- 2) ragged batch, bf16 weights (fast MXU path), default tiling ---------
    #     (hidden=256 = module default; exercises minimal batch padding and the
    #      per-chip grid choice: 1 big tile on v5e/v6e, 2 balanced tiles on v7x)
    batch2, state2, hidden2, action2 = 1030, 17, 256, 6
    x2 = jax.random.normal(kx2, (batch2, state2), dtype=jnp.float32)
    params2 = init_actor_params(kp2, state2, action2, hidden2, dtype=jnp.bfloat16)
    ref2 = actor_reference(x2, params2, max_action)

    out2 = jax.block_until_ready(actor_forward(x2, params2, max_action))
    assert out2.shape == (batch2, action2)
    assert jnp.allclose(out2, ref2, atol=5e-2, rtol=5e-2), float(jnp.max(jnp.abs(out2 - ref2)))

    # --- 3) forced multi-step batch grid (small tile cap) -----------------------
    out3 = jax.block_until_ready(
        actor_forward(x2, params2, max_action, max_tile_rows=256))
    assert out3.shape == (batch2, action2)
    assert jnp.allclose(out3, ref2, atol=5e-2, rtol=5e-2), float(jnp.max(jnp.abs(out3 - ref2)))

    print("KERNEL_OK")
</pallas_src>

<mosaic_0001>
module attributes {stable_mosaic.version = 11 : i64} {
  func.func @actor_kernel(%arg0: i32, %arg1: memref<8x16xf32, #tpu.memory_space<vmem>>, %arg2: memref<16x32xf32, #tpu.memory_space<vmem>>, %arg3: memref<1x32xf32, #tpu.memory_space<vmem>>, %arg4: memref<32x32xf32, #tpu.memory_space<vmem>>, %arg5: memref<1x32xf32, #tpu.memory_space<vmem>>, %arg6: memref<32x128xf32, #tpu.memory_space<vmem>>, %arg7: memref<1x128xf32, #tpu.memory_space<vmem>>, %arg8: memref<8x128xf32, #tpu.memory_space<vmem>>) attributes {dimension_semantics = [#tpu.dimension_semantics<parallel>], iteration_bounds = array<i64: 1>, scalar_prefetch = 0 : i64, scratch_operands = 0 : i64, tpu.core_type = #tpu.core_type<tc>, window_params = [{transform_indices = @transform_0, window_bounds = array<i64: 8, 16>}, {pipeline_mode = #tpu.pipeline_mode<synchronous>, transform_indices = @transform_1, window_bounds = array<i64: 16, 32>}, {pipeline_mode = #tpu.pipeline_mode<synchronous>, transform_indices = @transform_2, window_bounds = array<i64: 1, 32>}, {pipeline_mode = #tpu.pipeline_mode<synchronous>, transform_indices = @transform_3, window_bounds = array<i64: 32, 32>}, {pipeline_mode = #tpu.pipeline_mode<synchronous>, transform_indices = @transform_4, window_bounds = array<i64: 1, 32>}, {pipeline_mode = #tpu.pipeline_mode<synchronous>, transform_indices = @transform_5, window_bounds = array<i64: 32, 128>}, {pipeline_mode = #tpu.pipeline_mode<synchronous>, transform_indices = @transform_6, window_bounds = array<i64: 1, 128>}, {transform_indices = @transform_7, window_bounds = array<i64: 8, 128>}]} {
    %c0 = arith.constant 0 : index
    %c0_0 = arith.constant 0 : index
    %0 = vector.load %arg1[%c0, %c0_0] : memref<8x16xf32, #tpu.memory_space<vmem>>, vector<8x16xf32>
    %c0_1 = arith.constant 0 : index
    %c0_2 = arith.constant 0 : index
    %1 = vector.load %arg2[%c0_1, %c0_2] : memref<16x32xf32, #tpu.memory_space<vmem>>, vector<16x32xf32>
    %cst = arith.constant dense<0.000000e+00> : vector<8x32xf32>
    %2 = tpu.matmul %0, %1, %cst {dimension_numbers = #tpu.dot_dimension_numbers<[1], [0], [0], [1], [0, 0, 1, 1], [], []>} : vector<8x16xf32>, vector<16x32xf32>, vector<8x32xf32> -> vector<8x32xf32>
    %c0_3 = arith.constant 0 : index
    %c0_4 = arith.constant 0 : index
    %3 = vector.load %arg3[%c0_3, %c0_4] : memref<1x32xf32, #tpu.memory_space<vmem>>, vector<1x32xf32>
    %4 = vector.broadcast %3 : vector<1x32xf32> to vector<8x32xf32>
    %5 = arith.addf %2, %4 : vector<8x32xf32>
    %cst_5 = arith.constant 0.000000e+00 : f32
    %6 = vector.broadcast %cst_5 : f32 to vector<8x32xf32>
    %7 = arith.maximumf %5, %6 : vector<8x32xf32>
    %c0_6 = arith.constant 0 : index
    %c0_7 = arith.constant 0 : index
    %8 = vector.load %arg4[%c0_6, %c0_7] : memref<32x32xf32, #tpu.memory_space<vmem>>, vector<32x32xf32>
    %cst_8 = arith.constant dense<0.000000e+00> : vector<8x32xf32>
    %9 = tpu.matmul %7, %8, %cst_8 {dimension_numbers = #tpu.dot_dimension_numbers<[1], [0], [0], [1], [0, 0, 1, 1], [], []>} : vector<8x32xf32>, vector<32x32xf32>, vector<8x32xf32> -> vector<8x32xf32>
    %c0_9 = arith.constant 0 : index
    %c0_10 = arith.constant 0 : index
    %10 = vector.load %arg5[%c0_9, %c0_10] : memref<1x32xf32, #tpu.memory_space<vmem>>, vector<1x32xf32>
    %11 = vector.broadcast %10 : vector<1x32xf32> to vector<8x32xf32>
    %12 = arith.addf %9, %11 : vector<8x32xf32>
    %cst_11 = arith.constant 0.000000e+00 : f32
    %13 = vector.broadcast %cst_11 : f32 to vector<8x32xf32>
    %14 = arith.maximumf %12, %13 : vector<8x32xf32>
    %c0_12 = arith.constant 0 : index
    %c0_13 = arith.constant 0 : index
    %15 = vector.load %arg6[%c0_12, %c0_13] : memref<32x128xf32, #tpu.memory_space<vmem>>, vector<32x128xf32>
    %cst_14 = arith.constant dense<0.000000e+00> : vector<8x128xf32>
    %16 = tpu.matmul %14, %15, %cst_14 {dimension_numbers = #tpu.dot_dimension_numbers<[1], [0], [0], [1], [0, 0, 1, 1], [], []>} : vector<8x32xf32>, vector<32x128xf32>, vector<8x128xf32> -> vector<8x128xf32>
    %c0_15 = arith.constant 0 : index
    %c0_16 = arith.constant 0 : index
    %17 = vector.load %arg7[%c0_15, %c0_16] : memref<1x128xf32, #tpu.memory_space<vmem>>, vector<1x128xf32>
    %18 = vector.broadcast %17 : vector<1x128xf32> to vector<8x128xf32>
    %19 = arith.addf %16, %18 : vector<8x128xf32>
    %20 = math.tanh %19 : vector<8x128xf32>
    %cst_17 = arith.constant 2.000000e+00 : f32
    %21 = vector.broadcast %cst_17 : f32 to vector<8x128xf32>
    %22 = arith.mulf %21, %20 : vector<8x128xf32>
    %c0_18 = arith.constant 0 : index
    %c0_19 = arith.constant 0 : index
    %23 = vector.load %arg8[%c0_18, %c0_19] : memref<8x128xf32, #tpu.memory_space<vmem>>, vector<8x128xf32>
    tpu.vector_store %arg8[%c0_18, %c0_19], %22 {strides = array<i32>} : memref<8x128xf32, #tpu.memory_space<vmem>>, vector<8x128xf32>,
    return
  }
  func.func @transform_0(%arg0: i32) -> (i32, i32) {
    %c0_i32 = arith.constant 0 : i32
    %c0_i32_0 = arith.constant 0 : i32
    return %arg0, %c0_i32 : i32, i32
  }
  func.func @transform_1(%arg0: i32) -> (i32, i32) {
    %c0_i32 = arith.constant 0 : i32
    %c0_i32_0 = arith.constant 0 : i32
    %c0_i32_1 = arith.constant 0 : i32
    return %c0_i32, %c0_i32_0 : i32, i32
  }
  func.func @transform_2(%arg0: i32) -> (i32, i32) {
    %c0_i32 = arith.constant 0 : i32
    %c0_i32_0 = arith.constant 0 : i32
    %c0_i32_1 = arith.constant 0 : i32
    return %c0_i32, %c0_i32_0 : i32, i32
  }
  func.func @transform_3(%arg0: i32) -> (i32, i32) {
    %c0_i32 = arith.constant 0 : i32
    %c0_i32_0 = arith.constant 0 : i32
    %c0_i32_1 = arith.constant 0 : i32
    return %c0_i32, %c0_i32_0 : i32, i32
  }
  func.func @transform_4(%arg0: i32) -> (i32, i32) {
    %c0_i32 = arith.constant 0 : i32
    %c0_i32_0 = arith.constant 0 : i32
    %c0_i32_1 = arith.constant 0 : i32
    return %c0_i32, %c0_i32_0 : i32, i32
  }
  func.func @transform_5(%arg0: i32) -> (i32, i32) {
    %c0_i32 = arith.constant 0 : i32
    %c0_i32_0 = arith.constant 0 : i32
    %c0_i32_1 = arith.constant 0 : i32
    return %c0_i32, %c0_i32_0 : i32, i32
  }
  func.func @transform_6(%arg0: i32) -> (i32, i32) {
    %c0_i32 = arith.constant 0 : i32
    %c0_i32_0 = arith.constant 0 : i32
    %c0_i32_1 = arith.constant 0 : i32
    return %c0_i32, %c0_i32_0 : i32, i32
  }
  func.func @transform_7(%arg0: i32) -> (i32, i32) {
    %c0_i32 = arith.constant 0 : i32
    %c0_i32_0 = arith.constant 0 : i32
    return %arg0, %c0_i32 : i32, i32
  }
}

</mosaic_0001>

<bundles_post_ra>
// kernel: tpu_custom_call.1
= control target key start
LH: loop header
LB: loop body
LE: loop exit
PB: predicated region body
PF: predicated region fallthrough
CT: control target
= control target key end

     0   :  { %12 = vsyncpa [#allocation3], 0  ;;  %s609_s0 = inlined_call_operand.hbm [shape: f32[8,16], index: 0, kind: input, shape index: {}]   ;;  %s610_s1 = inlined_call_operand.hbm [shape: f32[16,32], index: 1, kind: input, shape index: {}]   ;;  %s611_s2 = inlined_call_operand.vmem [shape: f32[1,32], index: 2, kind: input, shape index: {}]   ;;  %s612_s3 = inlined_call_operand.hbm [shape: f32[32,32], index: 3, kind: input, shape index: {}]   ;;  %s613_s4 = inlined_call_operand.vmem [shape: f32[1,32], index: 4, kind: input, shape index: {}]   ;;  %s614_s5 = inlined_call_operand.hbm [shape: f32[32,128], index: 5, kind: input, shape index: {}]   ;;  %s615_s6 = inlined_call_operand.vmem [shape: f32[1,128], index: 6, kind: input, shape index: {}]   ;;  %s616_s7 = inlined_call_operand.hbm [shape: f32[8,128], index: 7, kind: output, shape index: {}]  }
   0x1   :  { %13 = vsyncpa [#allocation6], 0 }
   0x2   :  { %14 = vsyncpa [#allocation9], 0 }
   0x3   :  { %15 = vsyncpa [#allocation4], 0  ;;  %s522_s24 = smov [#allocation5]  }
   0x4   :  { %s31_s25 = sshll.u32 %s522_s24, 4  ;;  %s32_s25 = int_to_ptr.vmem [resolvable:$true] %s31_s25 }
   0x5   :  { %s422_s26 = scalar_lea.vmem %s32_s25, 256  ;;  %p427_p1 = scmp.lt.s32.totalorder %s32_s25, %s32_s25 }
   0x6   :  { %p423_p0 = scmp.ne.s32.totalorder %s32_s25, %s422_s26  ;;  %p428_p2 = scmp.lt.s32.totalorder %s422_s26, %s422_s26 }
   0x8   :  { %p429_p3 = por %p428_p2, %p427_p1 }
   0xa   :  { %p430_p4 = pnand %p429_p3, %p423_p0 }
   0xc   :  { %433 = shalt.err (!%p430_p4)
}
   0xd   :  { %s523_s27 = smov 128   ;;  %s524_s28 = smov 8  }
   0xe   :  { %37 = dma.hbm_to_vmem [thread:$0]  %s610_s1, 256, %s32_s25, [#allocation6], %s523_s27, %s523_s27, %s524_s28  }
   0xf   :  { %s525_s8 = smov [#allocation2]   ;;  %s526_s10 = smov [#allocation7]  }
  0x10   :  { %s22_s9 = sshll.u32 %s525_s8, 4  ;;  %s45_s11 = sshll.u32 %s526_s10, 4  ;;  %s23_s9 = int_to_ptr.vmem [resolvable:$true] %s22_s9  ;;  %s46_s11 = int_to_ptr.vmem [resolvable:$true] %s45_s11 }
  0x11   :  { %s442_s12 = scalar_lea.vmem %s23_s9, 128  ;;  %p447_p6 = scmp.lt.s32.totalorder %s23_s9, %s23_s9 }
  0x12   :  { %p443_p5 = scmp.ne.s32.totalorder %s23_s9, %s442_s12  ;;  %p448_p7 = scmp.lt.s32.totalorder %s442_s12, %s442_s12 }
  0x14   :  { %p449_p8 = por %p448_p7, %p447_p6 }
  0x16   :  { %p450_p9 = pnand %p449_p8, %p443_p5 }
  0x18   :  { %453 = shalt.err (!%p450_p9)
}
  0x19   :  { %25 = dma.hbm_to_vmem [thread:$0]  %s609_s0, 128, %s23_s9, [#allocation3]  }
  0x1a   :  { %s462_s15 = scalar_lea.vmem %s46_s11, 512  ;;  %p467_p11 = scmp.lt.s32.totalorder %s46_s11, %s46_s11 }
  0x1b   :  { %p463_p10 = scmp.ne.s32.totalorder %s46_s11, %s462_s15  ;;  %p468_p12 = scmp.lt.s32.totalorder %s462_s15, %s462_s15 }
  0x1d   :  { %p469_p13 = por %p468_p12, %p467_p11 }
  0x1f   :  { %p470_p0 = pnand %p469_p13, %p463_p10 }
  0x21   :  { %473 = shalt.err (!%p470_p0)
}
  0x22   :  { %51 = dma.hbm_to_vmem [thread:$0]  %s612_s3, 512, %s46_s11, [#allocation6], %s523_s27, %s523_s27, %s524_s28  }
  0x23   :  { %s527_s17 = smov [#allocation8]  }
  0x24   :  { %s59_s18 = sshll.u32 %s527_s17, 4  ;;  %s60_s18 = int_to_ptr.vmem [resolvable:$true] %s59_s18 }
  0x25   :  { %s482_s19 = scalar_lea.vmem %s60_s18, 512  ;;  %p487_p2 = scmp.lt.s32.totalorder %s60_s18, %s60_s18 }
  0x26   :  { %p483_p1 = scmp.ne.s32.totalorder %s60_s18, %s482_s19  ;;  %p488_p3 = scmp.lt.s32.totalorder %s482_s19, %s482_s19 }
  0x28   :  { %p489_p4 = por %p488_p3, %p487_p2 }
  0x2a   :  { %p490_p5 = pnand %p489_p4, %p483_p1 }
  0x2c   :  { %493 = shalt.err (!%p490_p5)
}
  0x2d   :  { %65 = dma.hbm_to_vmem [thread:$0]  %s614_s5, 512, %s60_s18, [#allocation9], %s523_s27, %s523_s27, %s524_s28  }
  0x2e   :  { %514 = dma.done.wait [#allocation3], 128  }
  0x2f   :  { %515 = vsyncadd [#allocation3], 4294967168 }
  0x30   :  { %516 = dma.done.wait [#allocation6], 768  }
  0x31   :  { %517 = vsyncadd [#allocation6], 4294966528 }
  0x32   :  { %518 = dma.done.wait [#allocation9], 512  }
  0x33   :  { %519 = vsyncadd [#allocation9], 4294966784  ;;  %v528_v0 = vmov 0.0   ;;  %vm529_vm0 = vmmov 0   ;;  %v82_v1 = vld [vmem:[#allocation5 + $0x8] sm:$0xff]  ;;  %v81_v2 = vld [vmem:[#allocation5] sm:$0xff] }
  0x34   :  { %374 = vmatprep.subr.mxu0 %v528_v0  ;;  %378 = vmatprep.mubr.msk.f32.mxu0 %vm529_vm0, %v528_v0  ;;  %v80_v3 = vld [vmem:[#allocation2] sm:$0xff]  ;;  %vm90_vm1 = vcmask 130048   ;;  %v168_v4 = vld [vmem:[#allocation7 + $0x18] sm:$0xff]  ;;  %v167_v5 = vld [vmem:[#allocation7 + $0x10] sm:$0xff]  ;;  %vm176_vm2 = vcmask 261120   ;;  %s530_s24 = smov [#allocation10]  }
  0x35   :  { %381 = vmatprep.subr.mxu1 %v528_v0  ;;  %389 = vmatprep.mubr.msk.f32.mxu1 %vm529_vm0, %v528_v0  ;;  %v166_v6 = vld [vmem:[#allocation7 + $0x8] sm:$0xff]  ;;  %v165_v7 = vld [vmem:[#allocation7] sm:$0xff]  ;;  %v254_v8 = vld [vmem:[#allocation8 + $0x18] sm:$0xff]  ;;  %s344_s25 = sshll.u32 %s530_s24, 4  ;;  %s345_s25 = int_to_ptr.vmem [resolvable:$true] %s344_s25 }
  0x36   :  { %375 = vmatpush3.msra.mxu0 %v82_v1  ;;  %382 = vmatpush3.msra.mxu1 %v168_v4  ;;  %v355_v9 = vld [vmem:[%s611_s2] ss:$0 sm:$0xff]  ;;  %v253_v14 = vld [vmem:[#allocation8 + $0x10] sm:$0xff]  ;;  %v251_v16 = vld [vmem:[#allocation8] sm:$0xff]  ;;  %p499_p7 = scmp.lt.s32.totalorder %s345_s25, %s345_s25 }
  0x37   :  { %376 = vmatprep.subr.mxu0 %v528_v0  ;;  %383 = vmatprep.subr.mxu1 %v528_v0  ;;  %v252_v15 = vld [vmem:[#allocation8 + $0x8] sm:$0xff] }
  0x38   :  { %377 = vmatpush3.msra.mxu0 %v81_v2  ;;  %384 = vmatpush3.msra.mxu1 %v167_v5  ;;  %v357_v17 = vld [vmem:[%s613_s4] ss:$0 sm:$0xff]  ;;  %s494_s4 = scalar_lea.vmem %s345_s25, 128 }
  0x39   :  { %379 = vmatmul.mubr.msk.f32.vlgmr.msra.gmra.mxu0 %vm90_vm1, %v80_v3  ;;  %392 = vmatprep.subr.mxu0 %v528_v0  ;;  %v359_v22 = vld [vmem:[%s615_s6] ss:$0 sm:$0xff]  ;;  %p495_p6 = scmp.ne.s32.totalorder %s345_s25, %s494_s4  ;;  %p500_p8 = scmp.lt.s32.totalorder %s494_s4, %s494_s4 }
  0x3a   :  { %400 = vmatprep.mubr.msk.f32.mxu0 %vm529_vm0, %v528_v0  ;;  %385 = vmatprep.subr.mxu1 %v528_v0 }
  0x3b   :  { %386 = vmatpush3.msra.mxu1 %v166_v6  ;;  %393 = vmatpush3.msra.mxu0 %v254_v8  ;;  %p501_p9 = por %p500_p8, %p499_p7 }
  0x3c   :  { %387 = vmatprep.subr.mxu1 %v528_v0  ;;  %394 = vmatprep.subr.mxu0 %v528_v0 }
  0x3d   :  { %388 = vmatpush3.msra.mxu1 %v165_v7  ;;  %395 = vmatpush3.msra.mxu0 %v253_v14  ;;  %p502_p10 = pnand %p501_p9, %p495_p6 }
  0x3e   :  { %396 = vmatprep.subr.mxu0 %v528_v0 }
  0x3f   :  { %397 = vmatpush3.msra.mxu0 %v252_v15 }
  0x40   :  { %398 = vmatprep.subr.mxu0 %v528_v0 }
  0x41   :  { %399 = vmatpush3.msra.mxu0 %v251_v16 }
  0xf9   :  { %v160_v10 = vpop.f32.mrf.mxu0 }
  0xfa   :  { %v161_v11 = vadd.f32 %v355_v9, %v160_v10 }
  0xfb   :  { %v380_v12 = vpop.f32.mrf.mxu0 }
  0xfc   :  { %v164_v13 = vmax.f32 %v161_v11, 0.0 }
  0xfe   :  { %390 = vmatmul.mubr.msk.f32.vlgmr.msra.gmra.mxu1 %vm176_vm2, %v164_v13 }
 0x1be   :  { %v246_v18 = vpop.f32.mrf.mxu1 }
 0x1bf   :  { %v247_v19 = vadd.f32 %v357_v17, %v246_v18 }
 0x1c0   :  { %v391_v20 = vpop.f32.mrf.mxu1 }
 0x1c1   :  { %v250_v21 = vmax.f32 %v247_v19, 0.0 }
 0x1c3   :  { %401 = vmatmul.mubr.msk.f32.vlgmr.msra.gmra.mxu0 %vm176_vm2, %v250_v21 }
 0x283   :  { %v331_v23 = vpop.f32.mrf.mxu0 }
 0x284   :  { %v332_v24 = vadd.f32 %v359_v22, %v331_v23 }
 0x285   :  { %v402_v25 = vpop.f32.mrf.mxu0 }
 0x286   :  { %412 = vtanh.f32 %v332_v24 }
 0x293   :  { %v413_v26 = vpop.eup %412 }
 0x294   :  { %v336_v27 = vmul.f32 2.0, %v413_v26 }
 0x296   :  { %337 = vst [vmem:[#allocation10] sm:$0xff] %v336_v27 }
 0x297   :  { %505 = shalt.err (!%p502_p10)
}
 0x298   :  { %347 = dma.vmem_to_hbm [thread:$0]  %s345_s25, 128, %s616_s7, [#allocation4]  }
 0x299   :  { %520 = dma.done.wait [#allocation4], 128  }
 0x29a   :  { %521 = vsyncadd [#allocation4], 4294967168 }
 0x29b   :  { %351 = vsyncpa [#allocation3], 1 }
 0x29c   :  { %352 = vsyncpa [#allocation6], 1 }
 0x29d   :  { %353 = vsyncpa [#allocation9], 1 }
 0x29e   :  { %354 = vsyncpa [#allocation4], 1 }

</bundles_post_ra>
